<compile_context>
chip_gen: v7x
topology: tpu7x:2x2x1
jax: 0.10.0
libtpu: 0.0.40
codegen_flags: <defaults>
</compile_context>

<pallas_src>
import functools

import jax
import jax.numpy as jnp
from jax import lax
from jax.experimental import pallas as pl
from jax.experimental.pallas import tpu as pltpu

_CHUNK_ROWS = 8   # 8 sublanes x 128 lanes = one f32 vreg per intermediate


def _vmem_caps():
    """Per-generation tile budget / scoped-VMEM limit (v7x: 64 MiB per core)."""
    try:
        cap = int(pltpu.get_tpu_info().vmem_capacity_bytes)
    except Exception:
        cap = 128 * 1024 * 1024
    tile_budget = min(12 * 1024 * 1024, max(4 * 1024 * 1024, cap // 6))
    vmem_limit = int(min(cap // 2, 48 * 1024 * 1024))
    return tile_budget, vmem_limit


def _pick_tile_rows(rows8, class_num, itemsize, budget, par):
    """Largest pixel-row tile whose double-buffered footprint fits `budget`."""
    # Bytes per row of 128 pixels held live by the pipeline:
    #   logits block (x2 double buffer) + labels block (x2).
    per_row = 2 * 128 * (class_num * itemsize + 4)
    max_rows = max(8, (int(budget // per_row) // 8) * 8)
    if rows8 <= max_rows * par:
        return -(-rows8 // (8 * par)) * 8          # one tile per parallel slice
    # Search near max_rows for the tile minimizing row padding while keeping
    # per-step work within ~2x of the largest legal tile.
    best_tr = max_rows
    best_pad = (-rows8) % (max_rows * par)
    tr = max_rows - 8
    lo = max(8, max_rows // 2)
    while tr >= lo and best_pad > 0:
        pad = (-rows8) % (tr * par)
        if pad < best_pad:
            best_tr, best_pad = tr, pad
        tr -= 8
    return best_tr


def _backce_kernel(missing_ref, x_ref, lab_ref, loss_ref, cnt_ref, *,
                   class_num, ignore_lb, eps, num_chunks):
    t = pl.program_id(2)

    @pl.when(t == 0)
    def _zero():
        loss_ref[...] = jnp.zeros_like(loss_ref)
        cnt_ref[...] = jnp.zeros_like(cnt_ref)

    # Tiny SMEM scalars: per-class "missing" flags + "any class missing" flag.
    miss_f = [missing_ref[c].astype(jnp.float32) for c in range(class_num)]
    has_missing = missing_ref[class_num].astype(jnp.float32)

    def body(i, carry):
        loss_acc, cnt_acc = carry
        r = pl.multiple_of(i * _CHUNK_ROWS, _CHUNK_ROWS)

        lab = lab_ref[0, pl.ds(r, _CHUNK_ROWS), :]          # (8, 128) int32
        is_ign = lab == ignore_lb
        ign_f = is_ign.astype(jnp.float32)

        # Numerically stable softmax pieces over the (small, unrolled) C axis.
        m = x_ref[0, 0, pl.ds(r, _CHUNK_ROWS), :].astype(jnp.float32)
        for c in range(1, class_num):
            m = jnp.maximum(
                m, x_ref[0, c, pl.ds(r, _CHUNK_ROWS), :].astype(jnp.float32))

        z = jnp.zeros_like(m)
        qnum = jnp.zeros_like(m)
        bg = jnp.zeros_like(m)
        for c in range(class_num):
            e = jnp.exp(
                x_ref[0, c, pl.ds(r, _CHUNK_ROWS), :].astype(jnp.float32) - m)
            z = z + e
            qnum = qnum + jnp.where(lab == c, e, 0.0)        # target gather
            bg = bg + e * miss_f[c]                          # background sum

        qnum = qnum + ign_f * bg
        # -log(q + eps) with q = qnum / z, computed divide-free (EUP logs):
        lp = jnp.log(z) - jnp.log(qnum + eps * z)

        w = jnp.where(is_ign, has_missing, 1.0)   # ignore pixels count only when
        w = jnp.where(lab < 0, 0.0, w)            # a class is missing; -1 = pad

        return loss_acc + lp * w, cnt_acc + w

    init = (jnp.zeros((_CHUNK_ROWS, 128), jnp.float32),
            jnp.zeros((_CHUNK_ROWS, 128), jnp.float32))
    unroll = num_chunks if num_chunks <= 8 else None
    loss_acc, cnt_acc = lax.fori_loop(0, num_chunks, body, init, unroll=unroll)

    # Resident output blocks act as the (8, 128) f32 accumulators.
    loss_ref[...] += loss_acc[None, None]
    cnt_ref[...] += cnt_acc[None, None]


def back_ce_loss(logits, labels, class_num, ignore_lb=255):
    """JAX/Pallas equivalent of BackCELoss(class_num, ignore_lb).forward."""
    B, C, H, W = logits.shape
    assert C == class_num, "logits channel dim must equal class_num"
    n_pix = H * W

    labels_i = labels.astype(jnp.int32).reshape(B, n_pix)

    # [missing_0, ..., missing_{C-1}, has_missing] via compare + any reduce
    # (pure VPU work at HBM bandwidth; no bincount scatter pass).
    cls = jnp.arange(C, dtype=jnp.int32)
    present = jnp.any(labels_i[:, :, None] == cls[None, None, :], axis=(0, 1))
    missing = jnp.logical_not(present).astype(jnp.int32)
    has_missing = jnp.logical_not(jnp.all(present)).astype(jnp.int32)
    prefetch = jnp.concatenate([missing, has_missing[None]])

    itemsize = jnp.dtype(logits.dtype).itemsize
    tile_budget, vmem_limit = _vmem_caps()

    rows8 = -(-(-(-n_pix // 128)) // 8) * 8            # ceil(n_pix/128) -> mult of 8
    # Rows split so v7x's second TensorCore has work even when B == 1
    # (documentation-only on single-core v5e/v6e).
    par = 2 if (B == 1 and rows8 >= 2 * _CHUNK_ROWS) else 1
    tr = _pick_tile_rows(rows8, C, itemsize, tile_budget, par)
    rows_padded = -(-rows8 // (tr * par)) * (tr * par)
    pix_padded = rows_padded * 128

    x = logits.reshape(B, C, n_pix)                    # keep native dtype
    if pix_padded != n_pix:
        # TODO(synk): only hit for ragged / tiny shapes; an in-kernel iota mask
        # on the last tile would avoid this extra HBM pass over the logits.
        x = jnp.pad(x, ((0, 0), (0, 0), (0, pix_padded - n_pix)))
        labels_i = jnp.pad(labels_i, ((0, 0), (0, pix_padded - n_pix)),
                           constant_values=-1)

    x = x.reshape(B, C, rows_padded, 128)              # free reshape, no transpose
    lab = labels_i.reshape(B, rows_padded, 128)
    # TODO(synk): on v5e (HBM-bound), pre-casting logits to bf16 and labels to
    # int16 halves the bytes if the caller accepts the numeric change.

    n_tiles = rows_padded // (tr * par)
    grid = (B, par, n_tiles)

    kernel = functools.partial(_backce_kernel, class_num=C,
                               ignore_lb=int(ignore_lb), eps=1e-7,
                               num_chunks=tr // _CHUNK_ROWS)

    out_shape = (jax.ShapeDtypeStruct((B, par, 8, 128), jnp.float32),
                 jax.ShapeDtypeStruct((B, par, 8, 128), jnp.float32))
    out_spec = pl.BlockSpec((1, 1, 8, 128), lambda b, p, t, m: (b, p, 0, 0))

    loss_parts, cnt_parts = pl.pallas_call(
        kernel,
        out_shape=out_shape,
        grid_spec=pltpu.PrefetchScalarGridSpec(
            num_scalar_prefetch=1,
            grid=grid,
            in_specs=[
                pl.BlockSpec((1, C, tr, 128),
                             lambda b, p, t, m: (b, 0, p * n_tiles + t, 0)),
                pl.BlockSpec((1, tr, 128),
                             lambda b, p, t, m: (b, p * n_tiles + t, 0)),
            ],
            out_specs=[out_spec, out_spec],
        ),
        compiler_params=pltpu.CompilerParams(
            dimension_semantics=("parallel", "parallel", "arbitrary"),
            vmem_limit_bytes=vmem_limit,
        ),
    )(prefetch, x, lab)

    # TODO(synk): if every pixel is ignore_lb and no class is missing, the
    # denominator is 0 (NaN) where PyTorch's NLLLoss would raise.
    return jnp.sum(loss_parts) / jnp.sum(cnt_parts)


def _reference_loss(logits, labels, class_num, ignore_lb=255):
    """Pure-JAX reference with the same forward semantics."""
    probs = jax.nn.softmax(logits.astype(jnp.float32), axis=1)
    present = jnp.stack([jnp.any(labels == c) for c in range(class_num)])
    missing = jnp.logical_not(present)
    has_missing = jnp.any(missing).astype(jnp.float32)
    cls = jnp.arange(class_num)
    onehot = (labels[:, None, :, :] == cls[None, :, None, None]).astype(jnp.float32)
    q_valid = jnp.sum(probs * onehot, axis=1)
    q_bg = jnp.sum(probs * missing.astype(jnp.float32)[None, :, None, None], axis=1)
    is_ign = labels == ignore_lb
    q = jnp.where(is_ign, q_bg, q_valid)
    w = jnp.where(is_ign, has_missing, 1.0)
    lp = -jnp.log(q + 1e-7)
    return jnp.sum(lp * w) / jnp.sum(w)


if __name__ == "__main__":
    key = jax.random.PRNGKey(0)
    k_log, k_lab, k_ign = jax.random.split(key, 3)

    B, C, H, W = 2, 4, 16, 16
    logits = jax.random.normal(k_log, (B, C, H, W), dtype=jnp.float32)
    # Labels only use classes {0, 1, 2}: class 3 is absent, so the module's
    # "background" (sum-of-missing-classes) channel path is exercised.  A few
    # pixels carry the ignore label (255) and get mapped to that channel.
    labels = jax.random.randint(k_lab, (B, H, W), 0, C - 1, dtype=jnp.int32)
    ign_mask = jax.random.bernoulli(k_ign, 0.1, (B, H, W))
    labels = jnp.where(ign_mask, jnp.int32(255), labels)

    loss = back_ce_loss(logits, labels, class_num=C, ignore_lb=255)
    loss = jax.block_until_ready(loss)

    ref = jax.block_until_ready(_reference_loss(logits, labels, C, 255))
    assert jnp.allclose(loss, ref, rtol=1e-5, atol=1e-5), (loss, ref)

    print("KERNEL_OK")
</pallas_src>

<mosaic_0001>
module attributes {stable_mosaic.version = 11 : i64} {
  func.func @_backce_kernel(%arg0: i32, %arg1: i32, %arg2: i32, %arg3: memref<5xi32, #tpu.memory_space<smem>>, %arg4: memref<1x4x8x128xf32, #tpu.memory_space<vmem>>, %arg5: memref<1x8x128xi32, #tpu.memory_space<vmem>>, %arg6: memref<1x1x8x128xf32, #tpu.memory_space<vmem>>, %arg7: memref<1x1x8x128xf32, #tpu.memory_space<vmem>>) attributes {dimension_semantics = [#tpu.dimension_semantics<parallel>, #tpu.dimension_semantics<parallel>, #tpu.dimension_semantics<arbitrary>], iteration_bounds = array<i64: 2, 1, 1>, scalar_prefetch = 1 : i64, scratch_operands = 0 : i64, tpu.core_type = #tpu.core_type<tc>, window_params = [{transform_indices = @transform_0, window_bounds = array<i64: 1, 4, 8, 128>}, {transform_indices = @transform_1, window_bounds = array<i64: 1, 8, 128>}, {transform_indices = @transform_2, window_bounds = array<i64: 1, 1, 8, 128>}, {transform_indices = @transform_3, window_bounds = array<i64: 1, 1, 8, 128>}]} {
    %c0_i32 = arith.constant 0 : i32
    %0 = arith.cmpi eq, %arg2, %c0_i32 : i32
    %1 = arith.extui %0 : i1 to i32
    %c0_i32_0 = arith.constant 0 : i32
    %2 = arith.cmpi ne, %1, %c0_i32_0 : i32
    scf.if %2 {
      %cst_58 = arith.constant 0.000000e+00 : f32
      %124 = vector.broadcast %cst_58 : f32 to vector<1x1x8x128xf32>
      %c0_59 = arith.constant 0 : index
      %c0_60 = arith.constant 0 : index
      %c0_61 = arith.constant 0 : index
      %c0_62 = arith.constant 0 : index
      %125 = vector.load %arg6[%c0_59, %c0_60, %c0_61, %c0_62] : memref<1x1x8x128xf32, #tpu.memory_space<vmem>>, vector<1x1x8x128xf32>
      tpu.vector_store %arg6[%c0_59, %c0_60, %c0_61, %c0_62], %124 {strides = array<i32>} : memref<1x1x8x128xf32, #tpu.memory_space<vmem>>, vector<1x1x8x128xf32>,
      %cst_63 = arith.constant 0.000000e+00 : f32
      %126 = vector.broadcast %cst_63 : f32 to vector<1x1x8x128xf32>
      %c0_64 = arith.constant 0 : index
      %c0_65 = arith.constant 0 : index
      %c0_66 = arith.constant 0 : index
      %c0_67 = arith.constant 0 : index
      %127 = vector.load %arg7[%c0_64, %c0_65, %c0_66, %c0_67] : memref<1x1x8x128xf32, #tpu.memory_space<vmem>>, vector<1x1x8x128xf32>
      tpu.vector_store %arg7[%c0_64, %c0_65, %c0_66, %c0_67], %126 {strides = array<i32>} : memref<1x1x8x128xf32, #tpu.memory_space<vmem>>, vector<1x1x8x128xf32>,
    } else {
    }
    %c0 = arith.constant 0 : index
    %3 = memref.load %arg3[%c0] : memref<5xi32, #tpu.memory_space<smem>>
    %4 = arith.sitofp %3 : i32 to f32
    %c1 = arith.constant 1 : index
    %5 = memref.load %arg3[%c1] : memref<5xi32, #tpu.memory_space<smem>>
    %6 = arith.sitofp %5 : i32 to f32
    %c2 = arith.constant 2 : index
    %7 = memref.load %arg3[%c2] : memref<5xi32, #tpu.memory_space<smem>>
    %8 = arith.sitofp %7 : i32 to f32
    %c3 = arith.constant 3 : index
    %9 = memref.load %arg3[%c3] : memref<5xi32, #tpu.memory_space<smem>>
    %10 = arith.sitofp %9 : i32 to f32
    %c4 = arith.constant 4 : index
    %11 = memref.load %arg3[%c4] : memref<5xi32, #tpu.memory_space<smem>>
    %12 = arith.sitofp %11 : i32 to f32
    %cst = arith.constant 0.000000e+00 : f32
    %13 = vector.broadcast %cst : f32 to vector<8x128xf32>
    %cst_1 = arith.constant 0.000000e+00 : f32
    %14 = vector.broadcast %cst_1 : f32 to vector<8x128xf32>
    %c0_i32_2 = arith.constant 0 : i32
    %c8_i32 = arith.constant 8 : i32
    %15 = arith.muli %c0_i32_2, %c8_i32 : i32
    %16 = tpu.assume_multiple %15, 8 : i32
    %c0_3 = arith.constant 0 : index
    %17 = arith.index_cast %16 : i32 to index
    %c0_4 = arith.constant 0 : index
    %18 = vector.load %arg5[%c0_3, %17, %c0_4] : memref<1x8x128xi32, #tpu.memory_space<vmem>>, vector<1x8x128xi32>
    %19 = vector.shape_cast %18 : vector<1x8x128xi32> to vector<8x128xi32>
    %c255_i32 = arith.constant 255 : i32
    %20 = vector.broadcast %c255_i32 : i32 to vector<8x128xi32>
    %21 = arith.cmpi eq, %19, %20 : vector<8x128xi32>
    %22 = arith.extui %21 : vector<8x128xi1> to vector<8x128xi32>
    %23 = arith.sitofp %22 : vector<8x128xi32> to vector<8x128xf32>
    %c0_5 = arith.constant 0 : index
    %c0_6 = arith.constant 0 : index
    %24 = arith.index_cast %16 : i32 to index
    %c0_7 = arith.constant 0 : index
    %25 = vector.load %arg4[%c0_5, %c0_6, %24, %c0_7] : memref<1x4x8x128xf32, #tpu.memory_space<vmem>>, vector<1x1x8x128xf32>
    %26 = vector.shape_cast %25 : vector<1x1x8x128xf32> to vector<8x128xf32>
    %c0_8 = arith.constant 0 : index
    %c1_9 = arith.constant 1 : index
    %27 = arith.index_cast %16 : i32 to index
    %c0_10 = arith.constant 0 : index
    %28 = vector.load %arg4[%c0_8, %c1_9, %27, %c0_10] : memref<1x4x8x128xf32, #tpu.memory_space<vmem>>, vector<1x1x8x128xf32>
    %29 = vector.shape_cast %28 : vector<1x1x8x128xf32> to vector<8x128xf32>
    %30 = arith.maximumf %26, %29 : vector<8x128xf32>
    %c0_11 = arith.constant 0 : index
    %c2_12 = arith.constant 2 : index
    %31 = arith.index_cast %16 : i32 to index
    %c0_13 = arith.constant 0 : index
    %32 = vector.load %arg4[%c0_11, %c2_12, %31, %c0_13] : memref<1x4x8x128xf32, #tpu.memory_space<vmem>>, vector<1x1x8x128xf32>
    %33 = vector.shape_cast %32 : vector<1x1x8x128xf32> to vector<8x128xf32>
    %34 = arith.maximumf %30, %33 : vector<8x128xf32>
    %c0_14 = arith.constant 0 : index
    %c3_15 = arith.constant 3 : index
    %35 = arith.index_cast %16 : i32 to index
    %c0_16 = arith.constant 0 : index
    %36 = vector.load %arg4[%c0_14, %c3_15, %35, %c0_16] : memref<1x4x8x128xf32, #tpu.memory_space<vmem>>, vector<1x1x8x128xf32>
    %37 = vector.shape_cast %36 : vector<1x1x8x128xf32> to vector<8x128xf32>
    %38 = arith.maximumf %34, %37 : vector<8x128xf32>
    %cst_17 = arith.constant 0.000000e+00 : f32
    %39 = vector.broadcast %cst_17 : f32 to vector<8x128xf32>
    %cst_18 = arith.constant 0.000000e+00 : f32
    %40 = vector.broadcast %cst_18 : f32 to vector<8x128xf32>
    %cst_19 = arith.constant 0.000000e+00 : f32
    %41 = vector.broadcast %cst_19 : f32 to vector<8x128xf32>
    %c0_20 = arith.constant 0 : index
    %c0_21 = arith.constant 0 : index
    %42 = arith.index_cast %16 : i32 to index
    %c0_22 = arith.constant 0 : index
    %43 = vector.load %arg4[%c0_20, %c0_21, %42, %c0_22] : memref<1x4x8x128xf32, #tpu.memory_space<vmem>>, vector<1x1x8x128xf32>
    %44 = vector.shape_cast %43 : vector<1x1x8x128xf32> to vector<8x128xf32>
    %45 = arith.subf %44, %38 : vector<8x128xf32>
    %46 = math.exp %45 : vector<8x128xf32>
    %47 = arith.addf %39, %46 : vector<8x128xf32>
    %c0_i32_23 = arith.constant 0 : i32
    %48 = vector.broadcast %c0_i32_23 : i32 to vector<8x128xi32>
    %49 = arith.cmpi eq, %19, %48 : vector<8x128xi32>
    %cst_24 = arith.constant 0.000000e+00 : f32
    %50 = vector.broadcast %cst_24 : f32 to vector<8x128xf32>
    %51 = arith.select %49, %46, %50 : vector<8x128xi1>, vector<8x128xf32>
    %52 = arith.addf %40, %51 : vector<8x128xf32>
    %53 = vector.broadcast %4 : f32 to vector<8x128xf32>
    %54 = arith.mulf %46, %53 : vector<8x128xf32>
    %55 = arith.addf %41, %54 : vector<8x128xf32>
    %c0_25 = arith.constant 0 : index
    %c1_26 = arith.constant 1 : index
    %56 = arith.index_cast %16 : i32 to index
    %c0_27 = arith.constant 0 : index
    %57 = vector.load %arg4[%c0_25, %c1_26, %56, %c0_27] : memref<1x4x8x128xf32, #tpu.memory_space<vmem>>, vector<1x1x8x128xf32>
    %58 = vector.shape_cast %57 : vector<1x1x8x128xf32> to vector<8x128xf32>
    %59 = arith.subf %58, %38 : vector<8x128xf32>
    %60 = math.exp %59 : vector<8x128xf32>
    %61 = arith.addf %47, %60 : vector<8x128xf32>
    %c1_i32 = arith.constant 1 : i32
    %62 = vector.broadcast %c1_i32 : i32 to vector<8x128xi32>
    %63 = arith.cmpi eq, %19, %62 : vector<8x128xi32>
    %cst_28 = arith.constant 0.000000e+00 : f32
    %64 = vector.broadcast %cst_28 : f32 to vector<8x128xf32>
    %65 = arith.select %63, %60, %64 : vector<8x128xi1>, vector<8x128xf32>
    %66 = arith.addf %52, %65 : vector<8x128xf32>
    %67 = vector.broadcast %6 : f32 to vector<8x128xf32>
    %68 = arith.mulf %60, %67 : vector<8x128xf32>
    %69 = arith.addf %55, %68 : vector<8x128xf32>
    %c0_29 = arith.constant 0 : index
    %c2_30 = arith.constant 2 : index
    %70 = arith.index_cast %16 : i32 to index
    %c0_31 = arith.constant 0 : index
    %71 = vector.load %arg4[%c0_29, %c2_30, %70, %c0_31] : memref<1x4x8x128xf32, #tpu.memory_space<vmem>>, vector<1x1x8x128xf32>
    %72 = vector.shape_cast %71 : vector<1x1x8x128xf32> to vector<8x128xf32>
    %73 = arith.subf %72, %38 : vector<8x128xf32>
    %74 = math.exp %73 : vector<8x128xf32>
    %75 = arith.addf %61, %74 : vector<8x128xf32>
    %c2_i32 = arith.constant 2 : i32
    %76 = vector.broadcast %c2_i32 : i32 to vector<8x128xi32>
    %77 = arith.cmpi eq, %19, %76 : vector<8x128xi32>
    %cst_32 = arith.constant 0.000000e+00 : f32
    %78 = vector.broadcast %cst_32 : f32 to vector<8x128xf32>
    %79 = arith.select %77, %74, %78 : vector<8x128xi1>, vector<8x128xf32>
    %80 = arith.addf %66, %79 : vector<8x128xf32>
    %81 = vector.broadcast %8 : f32 to vector<8x128xf32>
    %82 = arith.mulf %74, %81 : vector<8x128xf32>
    %83 = arith.addf %69, %82 : vector<8x128xf32>
    %c0_33 = arith.constant 0 : index
    %c3_34 = arith.constant 3 : index
    %84 = arith.index_cast %16 : i32 to index
    %c0_35 = arith.constant 0 : index
    %85 = vector.load %arg4[%c0_33, %c3_34, %84, %c0_35] : memref<1x4x8x128xf32, #tpu.memory_space<vmem>>, vector<1x1x8x128xf32>
    %86 = vector.shape_cast %85 : vector<1x1x8x128xf32> to vector<8x128xf32>
    %87 = arith.subf %86, %38 : vector<8x128xf32>
    %88 = math.exp %87 : vector<8x128xf32>
    %89 = arith.addf %75, %88 : vector<8x128xf32>
    %c3_i32 = arith.constant 3 : i32
    %90 = vector.broadcast %c3_i32 : i32 to vector<8x128xi32>
    %91 = arith.cmpi eq, %19, %90 : vector<8x128xi32>
    %cst_36 = arith.constant 0.000000e+00 : f32
    %92 = vector.broadcast %cst_36 : f32 to vector<8x128xf32>
    %93 = arith.select %91, %88, %92 : vector<8x128xi1>, vector<8x128xf32>
    %94 = arith.addf %80, %93 : vector<8x128xf32>
    %95 = vector.broadcast %10 : f32 to vector<8x128xf32>
    %96 = arith.mulf %88, %95 : vector<8x128xf32>
    %97 = arith.addf %83, %96 : vector<8x128xf32>
    %98 = arith.mulf %23, %97 : vector<8x128xf32>
    %99 = arith.addf %94, %98 : vector<8x128xf32>
    %100 = math.log %89 : vector<8x128xf32>
    %cst_37 = arith.constant 1.000000e-07 : f32
    %101 = vector.broadcast %cst_37 : f32 to vector<8x128xf32>
    %102 = arith.mulf %101, %89 : vector<8x128xf32>
    %103 = arith.addf %99, %102 : vector<8x128xf32>
    %104 = math.log %103 : vector<8x128xf32>
    %105 = arith.subf %100, %104 : vector<8x128xf32>
    %cst_38 = arith.constant 1.000000e+00 : f32
    %106 = vector.broadcast %12 : f32 to vector<8x128xf32>
    %107 = vector.broadcast %cst_38 : f32 to vector<8x128xf32>
    %108 = arith.select %21, %106, %107 : vector<8x128xi1>, vector<8x128xf32>
    %c0_i32_39 = arith.constant 0 : i32
    %109 = vector.broadcast %c0_i32_39 : i32 to vector<8x128xi32>
    %110 = arith.cmpi slt, %19, %109 : vector<8x128xi32>
    %cst_40 = arith.constant 0.000000e+00 : f32
    %111 = vector.broadcast %cst_40 : f32 to vector<8x128xf32>
    %112 = arith.select %110, %111, %108 : vector<8x128xi1>, vector<8x128xf32>
    %113 = arith.mulf %105, %112 : vector<8x128xf32>
    %114 = arith.addf %13, %113 : vector<8x128xf32>
    %115 = arith.addf %14, %112 : vector<8x128xf32>
    %c1_i32_41 = arith.constant 1 : i32
    %c0_42 = arith.constant 0 : index
    %c0_43 = arith.constant 0 : index
    %c0_44 = arith.constant 0 : index
    %c0_45 = arith.constant 0 : index
    %116 = vector.load %arg6[%c0_42, %c0_43, %c0_44, %c0_45] : memref<1x1x8x128xf32, #tpu.memory_space<vmem>>, vector<1x1x8x128xf32>
    %117 = vector.shape_cast %114 : vector<8x128xf32> to vector<1x1x8x128xf32>
    %118 = arith.addf %116, %117 : vector<1x1x8x128xf32>
    %c0_46 = arith.constant 0 : index
    %c0_47 = arith.constant 0 : index
    %c0_48 = arith.constant 0 : index
    %c0_49 = arith.constant 0 : index
    %119 = vector.load %arg6[%c0_46, %c0_47, %c0_48, %c0_49] : memref<1x1x8x128xf32, #tpu.memory_space<vmem>>, vector<1x1x8x128xf32>
    tpu.vector_store %arg6[%c0_46, %c0_47, %c0_48, %c0_49], %118 {strides = array<i32>} : memref<1x1x8x128xf32, #tpu.memory_space<vmem>>, vector<1x1x8x128xf32>,
    %c0_50 = arith.constant 0 : index
    %c0_51 = arith.constant 0 : index
    %c0_52 = arith.constant 0 : index
    %c0_53 = arith.constant 0 : index
    %120 = vector.load %arg7[%c0_50, %c0_51, %c0_52, %c0_53] : memref<1x1x8x128xf32, #tpu.memory_space<vmem>>, vector<1x1x8x128xf32>
    %121 = vector.shape_cast %115 : vector<8x128xf32> to vector<1x1x8x128xf32>
    %122 = arith.addf %120, %121 : vector<1x1x8x128xf32>
    %c0_54 = arith.constant 0 : index
    %c0_55 = arith.constant 0 : index
    %c0_56 = arith.constant 0 : index
    %c0_57 = arith.constant 0 : index
    %123 = vector.load %arg7[%c0_54, %c0_55, %c0_56, %c0_57] : memref<1x1x8x128xf32, #tpu.memory_space<vmem>>, vector<1x1x8x128xf32>
    tpu.vector_store %arg7[%c0_54, %c0_55, %c0_56, %c0_57], %122 {strides = array<i32>} : memref<1x1x8x128xf32, #tpu.memory_space<vmem>>, vector<1x1x8x128xf32>,
    return
  }
  func.func @transform_0(%arg0: i32, %arg1: i32, %arg2: i32, %arg3: memref<5xi32, #tpu.memory_space<smem>>) -> (i32, i32, i32, i32) {
    %c1_i32 = arith.constant 1 : i32
    %0 = arith.muli %arg1, %c1_i32 : i32
    %1 = arith.addi %0, %arg2 : i32
    %c0_i32 = arith.constant 0 : i32
    %c0_i32_0 = arith.constant 0 : i32
    %c0_i32_1 = arith.constant 0 : i32
    return %arg0, %c0_i32, %1, %c0_i32_0 : i32, i32, i32, i32
  }
  func.func @transform_1(%arg0: i32, %arg1: i32, %arg2: i32, %arg3: memref<5xi32, #tpu.memory_space<smem>>) -> (i32, i32, i32) {
    %c1_i32 = arith.constant 1 : i32
    %0 = arith.muli %arg1, %c1_i32 : i32
    %1 = arith.addi %0, %arg2 : i32
    %c0_i32 = arith.constant 0 : i32
    %c0_i32_0 = arith.constant 0 : i32
    return %arg0, %1, %c0_i32 : i32, i32, i32
  }
  func.func @transform_2(%arg0: i32, %arg1: i32, %arg2: i32, %arg3: memref<5xi32, #tpu.memory_space<smem>>) -> (i32, i32, i32, i32) {
    %c0_i32 = arith.constant 0 : i32
    %c0_i32_0 = arith.constant 0 : i32
    %c0_i32_1 = arith.constant 0 : i32
    return %arg0, %arg1, %c0_i32, %c0_i32_0 : i32, i32, i32, i32
  }
  func.func @transform_3(%arg0: i32, %arg1: i32, %arg2: i32, %arg3: memref<5xi32, #tpu.memory_space<smem>>) -> (i32, i32, i32, i32) {
    %c0_i32 = arith.constant 0 : i32
    %c0_i32_0 = arith.constant 0 : i32
    %c0_i32_1 = arith.constant 0 : i32
    return %arg0, %arg1, %c0_i32, %c0_i32_0 : i32, i32, i32, i32
  }
}

</mosaic_0001>

<bundles_post_ra>
// kernel: tpu_custom_call.1
= control target key start
LH: loop header
LB: loop body
LE: loop exit
PB: predicated region body
PF: predicated region fallthrough
CT: control target
= control target key end

     0   :  { %s1189_s0 = inlined_call_operand.hbm [shape: s32[5], index: 0, kind: input, shape index: {}]   ;;  %s1190_s1 = inlined_call_operand.hbm [shape: f32[2,4,8,128], index: 1, kind: input, shape index: {}]   ;;  %s1191_s2 = inlined_call_operand.hbm [shape: s32[2,8,128], index: 2, kind: input, shape index: {}]   ;;  %s1192_s3 = inlined_call_operand.hbm [shape: f32[2,1,8,128], index: 3, kind: output, shape index: {0}]   ;;  %s1193_s4 = inlined_call_operand.hbm [shape: f32[2,1,8,128], index: 4, kind: output, shape index: {1}]  }
   0x1   :  { %s671_s17 = scalar_lea.hbm %s1189_s0, 16 }
   0x2   :  { %p672_p0 = scmp.ne.s32.totalorder %s1189_s0, %s671_s17  ;;  %p675_p1 = scmp.lt.u32.totalorder %s671_s17, %s1189_s0 }
   0x4   :  { %p677_p2 = pnand %p675_p1, %p672_p0 }
   0x6   :  { %680 = shalt.err (!%p677_p2)  }
   0x7   :  { %s863_s22 = smov [#allocation3]  }
   0x8   :  { %11 = dma.hbm_to_smem %s1189_s0, 16, %s863_s22, [#allocation2] }
   0x9   :  { %821 = dma.done.wait [#allocation2], 16 }
   0xa   :  { %822 = vsyncadd [#allocation2], 4294967280 }
   0xb   :  { %13 = sfence }
   0xc   :  { %14 = vsyncpa [#allocation5], 0 }
   0xd   :  { %16 = vsyncpa [#allocation5 + $0x1], 0 }
   0xe   :  { %17 = vsyncpa [#allocation8], 0 }
   0xf   :  { %19 = vsyncpa [#allocation8 + $0x1], 0 }
  0x10   :  { %20 = vsyncpa [#allocation6], 0 }
  0x11   :  { %22 = vsyncpa [#allocation6 + $0x1], 0 }
  0x12   :  { %23 = vsyncpa [#allocation11], 0 }
  0x13   :  { %25 = vsyncpa [#allocation11 + $0x1], 0  ;;  %s908_s25 = smov 0   ;;  %s910_s26 = smov 0  }
  0x14   :  { %s912_s27 = smov 0   ;;  %s914_s28 = smov 0  }
  0x15   :  { %s916_s0 = smov 0   ;;  %s918_s29 = smov 0  }
  0x16 LB: > { %s554_s30 = sadd.s32 4294967295, %s861_s29   ;;  %s555_s5 = sadd.s32 4294967294, %s861_s29   ;;  %s861_s29 = sphi %s918_s29, %s31_s29   ;;  %s857_s0 = sphi %s916_s0, %s1214_s0   ;;  %s853_s28 = sphi %s914_s28, %s1213_s28   ;;  %s849_s27 = sphi %s912_s27, %s1212_s27   ;;  %s845_s26 = sphi %s910_s26, %s1211_s26   ;;  %s841_s25 = sphi %s908_s25, %s1210_s25  }
  0x17   : > { %s50_s6 = sadd.s32 1, %s857_s0  ;;  %s61_s7 = sadd.s32 1, %s849_s27 }
  0x18   : > { %p52_p3 = scmp.ge.s32.totalorder %s50_s6, 2  ;;  %p68_p4 = scmp.ne.s32.totalorder %s849_s27, %s845_s26 }
  0x19   : > { %p69_p5 = scmp.eq.s32.totalorder %s861_s29, 0  ;;  %p74_p6 = scmp.ne.s32.totalorder %s845_s26, %s841_s25 }
  0x1a   : > { %s1216_s6 = smov (%p52_p3, %s50_s6), 0  ;;  %p75_p8 = scmp.eq.s32.totalorder %s554_s30, 0 }
  0x1b   : > { %p949_p7 = por %p69_p5, %p68_p4  ;;  %s56_s9 = ssub.s32 %s857_s0, %s1216_s6 }
  0x1c   : > { %p130_p9 = scmp.eq.s32.totalorder %s554_s30, 1  ;;  %p59_p10 = scmp.eq.s32.totalorder %s56_s9, 0 }
  0x1d   : > { %p955_p11 = por %p75_p8, %p74_p6  ;;  %p136_p13 = scmp.eq.s32.totalorder %s555_s5, 1 }
  0x1e   : > { %p959_p12 = por %p130_p9, %p68_p4  ;;  %p605_p2 = scmp.lt.s32.totalorder %s861_s29, 2 }
  0x1f   : > { %s1198_s10 = scalar_select %p955_p11, 1, 0 }
  0x20   : > { %s1199_s11 = scalar_select %p959_p12, 1, 0 }
  0x21   : > { %s964_s12 = scalar_select %p59_p10, %s849_s27, %s61_s7  }
  0x22   : > { %p966_p0 = por %p136_p13, %p74_p6  ;;  %s973_s14 = sand.u32 1, %s849_s27  }
  0x23   : > { %s558_s15 = sshll.u32 %s973_s14, 5  ;;  %s582_s16 = sshll.u32 %s857_s0, 9 }
  0x24   : > { %s1200_s13 = scalar_select %p966_p0, 1, 0 }
  0x25   : > { %s980_s19 = scalar_lea.hbm %s1190_s1, %s582_s16  ;;  %s188_s20 = scalar_lea.vmem [#allocation4], %s558_s15 }
  0x26   : > { %s197_s21 = sshll.u32 %s188_s20, 4  ;;  %p986_p3 = pnand %p605_p2, %p949_p7  ;;  %s982_s21 = int_to_ptr.vmem [resolvable:$true] %s197_s21 }
  0x27   : > { %s185_s23 = scalar_lea.sflag [#allocation5], %s973_s14  ;;  %s681_s24 = scalar_lea.hbm %s980_s19, 512 }
  0x28   : > { %p682_p5 = scmp.ne.s32.totalorder %s980_s19, %s681_s24  ;;  %p683_p6 = pneg %p986_p3 }
  0x29   : > { %s686_s7 = scalar_lea.hbm %s1190_s1, 1024  ;;  %p687_p7 = scmp.lt.u32.totalorder %s980_s19, %s1190_s1 }
  0x2a   : > { %p684_p8 = pnand %p683_p6, %p682_p5  ;;  %p688_p10 = scmp.lt.u32.totalorder %s686_s7, %s681_s24 }
  0x2b   : > { %p690_p2 = scmp.lt.u32.totalorder %s681_s24, %s980_s19 }
  0x2c   : > { %p685_p9 = pneg %p684_p8  ;;  %p689_p13 = por %p688_p10, %p687_p7 }
  0x2e   : > { %p691_p1 = por %p690_p2, %p689_p13 }
  0x30   : > { %p692_p4 = pnand %p691_p1, %p685_p9 }
  0x32   : > { %695 = shalt.err (!%p692_p4)
}
  0x33   : > { %s696_s15 = scalar_lea.vmem %s982_s21, 512  ;;  %s864_s16 = smov [#allocation4]  }
  0x34   : > { %p697_p5 = scmp.ne.s32.totalorder %s982_s21, %s696_s15  ;;  %s701_s17 = sshll.u32 %s864_s16, 4  ;;  %s702_s17 = int_to_ptr.vmem [resolvable:$false] %s701_s17 }
  0x35   : > { %s703_s18 = scalar_lea.vmem %s702_s17, 1024  ;;  %p704_p12 = scmp.lt.s32.totalorder %s982_s21, %s702_s17 }
  0x36   : > { %p699_p8 = pnand %p697_p5, %p683_p6  ;;  %p705_p7 = scmp.lt.s32.totalorder %s703_s18, %s696_s15 }
  0x38   : > { %p700_p0 = pneg %p699_p8  ;;  %p706_p10 = por %p705_p7, %p704_p12 }
  0x3a   : > { %p707_p13 = pnand %p706_p10, %p700_p0 }
  0x3c   : > { %710 = shalt.err (!%p707_p13)
}
  0x3d   : > { %s865_s20 = smov 128   ;;  %s866_s24 = smov 8  }
  0x3e   : > { %594 = dma.hbm_to_vmem [thread:$0]  (!%p986_p3), %s980_s19, 512, %s982_s21, %s185_s23, %s865_s20, %s865_s20, %s866_s24  }
  0x3f   : > { %p225_p1 = scmp.lt.s32.totalorder %s861_s29, 3  ;;  %s561_s30 = sshll.u32 %s973_s14, 3 }
  0x40   : > { %s562_s5 = sshll.u32 %s857_s0, 7  ;;  %p1202_p12 = scmp.ge.s32.totalorder %s861_s29, 1 }
  0x41   : > { %s1031_s15 = scalar_lea.hbm %s1191_s2, %s562_s5  ;;  %s211_s16 = scalar_lea.vmem [#allocation7], %s561_s30 }
  0x42   : > { %p1024_p0 = pnand %p1202_p12, %p225_p1  ;;  %s220_s17 = sshll.u32 %s211_s16, 4  ;;  %s221_s17 = int_to_ptr.vmem [resolvable:$true] %s220_s17 }
  0x43   : > { %s208_s19 = scalar_lea.sflag [#allocation8], %s973_s14  ;;  %s711_s21 = scalar_lea.hbm %s1031_s15, 128 }
  0x44   : > { %s1203_s7 = scalar_select %p1024_p0, 1, 0 }
  0x45   : > { %p712_p4 = scmp.ne.s32.totalorder %s1031_s15, %s711_s21  ;;  %s716_s20 = scalar_lea.hbm %s1191_s2, 256 }
  0x46   : > { %p717_p5 = scmp.lt.u32.totalorder %s1031_s15, %s1191_s2  ;;  %p718_p8 = scmp.lt.u32.totalorder %s716_s20, %s711_s21 }
  0x47   : > { %p714_p9 = pnand %p712_p4, %p683_p6  ;;  %p720_p10 = scmp.lt.u32.totalorder %s711_s21, %s1031_s15 }
  0x48   : > { %p719_p7 = por %p718_p8, %p717_p5 }
  0x49   : > { %p715_p2 = pneg %p714_p9 }
  0x4a   : > { %p721_p13 = por %p720_p10, %p719_p7 }
  0x4c   : > { %p722_p1 = pnand %p721_p13, %p715_p2 }
  0x4e   : > { %725 = shalt.err (!%p722_p1)
}
  0x4f   : > { %s726_s14 = scalar_lea.vmem %s221_s17, 128  ;;  %s867_s30 = smov [#allocation7]  }
  0x50   : > { %p727_p12 = scmp.ne.s32.totalorder %s221_s17, %s726_s14  ;;  %s731_s8 = sshll.u32 %s867_s30, 4  ;;  %s732_s8 = int_to_ptr.vmem [resolvable:$false] %s731_s8 }
  0x51   : > { %s733_s9 = scalar_lea.vmem %s732_s8, 256  ;;  %p734_p11 = scmp.lt.s32.totalorder %s221_s17, %s732_s8 }
  0x52   : > { %p729_p4 = pnand %p727_p12, %p683_p6  ;;  %p735_p0 = scmp.lt.s32.totalorder %s733_s9, %s726_s14 }
  0x54   : > { %p730_p9 = pneg %p729_p4  ;;  %p736_p5 = por %p735_p0, %p734_p11 }
  0x56   : > { %p737_p8 = pnand %p736_p5, %p730_p9 }
  0x58   : > { %740 = shalt.err (!%p737_p8)
}
  0x59   : > { %597 = dma.hbm_to_vmem [thread:$0]  (!%p986_p3), %s1031_s15, 128, %s221_s17, %s208_s19  }
  0x5a   : > { %p1204_p2 = scmp.ne.s32.totalorder %s1203_s7, 0 }
  0x5b   : > { %s1056_s16 = sand.u32 (!%p1204_p2), 1, %s845_s26   ;;  %p1205_p6 = scmp.ne.s32.totalorder (!%p1204_p2), %s1198_s10, 0 }
  0x5c   : > { %229 = sbr.rel (%p1204_p2) target bundleno = 187 (0xbb), region = 28  ;;  %s564_s21 = sshll.u32 (!%p1204_p2), %s1056_s16, 5 }
  0x5d   : > { %s232_s23 = scalar_lea.sflag (!%p1204_p2), [#allocation5], %s1056_s16  ;;  %s235_s18 = scalar_lea.vmem (!%p1204_p2), [#allocation4], %s564_s21 }
  0x63   : > { %824 = dma.done.wait (%p1205_p6), %s232_s23, 512  }
  0x64   : > { %826 = vsyncadd (%p1205_p6), %s232_s23, 4294966784  ;;  %s1065_s22 = sshll.u32 %s1056_s16, 3  ;;  %s241_s7 = scalar_lea.sflag [#allocation8], %s1056_s16 }
  0x65   : > { %s244_s15 = scalar_lea.vmem [#allocation7], %s1065_s22 }
  0x66   : > { %828 = dma.done.wait (%p1205_p6), %s241_s7, 128  }
  0x67   : > { %830 = vsyncadd (%p1205_p6), %s241_s7, 4294967168  ;;  %s571_s17 = sld [smem:[#allocation3 + $0x4]]  ;;  %v299_v0 = vld [vmem:[%s235_s18] sm:$0xff]  ;;  %v573_v1 = vld [vmem:[%s235_s18 + $0x8] sm:$0xff]  ;;  %s1196_s10 = sshll.u32 %s853_s28, 7 }
  0x68   : > { %v303_v2 = vmax.f32 %v299_v0, %v573_v1  ;;  %v574_v3 = vld [vmem:[%s235_s18 + $0x10] sm:$0xff]  ;;  %v575_v4 = vld [vmem:[%s235_s18 + $0x18] sm:$0xff]  ;;  %v1073_v5 = vld [vmem:[%s244_s15] sm:$0xff]  ;;  %s276_s20 = scalar_lea.vmem [#allocation10], %s1065_s22  ;;  %s1081_s5 = sld [smem:[#allocation3]] }
  0x69   : > { %vm296_vm0 = vcmp.eq.s32.totalorder %v1073_v5, 255  ;;  %vm363_vm1 = vcmp.lt.s32.totalorder %v1073_v5, 0  ;;  %s408_s24 = sshll.u32 %s276_s20, 4  ;;  %s1083_s14 = sld [smem:[#allocation3 + $0x1]]  ;;  %s1096_s24 = int_to_ptr.vmem [resolvable:$true] %s408_s24 }
  0x6a   : > { %v307_v6 = vmax.f32 %v303_v2, %v574_v3  ;;  %s1087_s30 = sld [smem:[#allocation3 + $0x2]]  ;;  %s1094_s21 = scalar_lea.hbm %s1193_s4, %s1196_s10 }
  0x6b   : > { %s1098_s23 = sld [smem:[#allocation3 + $0x3]]  ;;  %s380_s18 = scalar_lea.sflag [#allocation11], %s1056_s16 }
  0x6c   : > { %v311_v8 = vmax.f32 %v307_v6, %v575_v4  ;;  %s741_s7 = scalar_lea.vmem %s1096_s24, 128  ;;  %p1206_p3 = scmp.ne.s32.totalorder %s1199_s11, 0 }
  0x6d   : > { %s294_s19 = scvt.s32.f32 %s571_s17  ;;  %p742_p11 = scmp.ne.s32.totalorder %s1096_s24, %s741_s7 }
  0x6e   : > { %v312_v11 = vsub.f32 %v299_v0, %v311_v8  ;;  %v322_v12 = vsub.f32 %v573_v1, %v311_v8  ;;  %v332_v13 = vsub.f32 %v574_v3, %v311_v8  ;;  %v342_v14 = vsub.f32 %v575_v4, %v311_v8  ;;  %s868_s15 = smov [#allocation10]  }
  0x6f   : > { %v361_v7 = vstv %s294_s19  ;;  %p743_p0 = pnand %p742_p11, %p1206_p3  ;;  %s745_s17 = sshll.u32 %s868_s15, 4  ;;  %s746_s17 = int_to_ptr.vmem [resolvable:$false] %s745_s17 }
  0x70   : > { %v362_v9 = vsel %vm296_vm0, %v361_v7, 1.0  ;;  %v313_v15 = vmul.f32 1.442695, %v312_v11  ;;  %v323_v16 = vmul.f32 1.442695, %v322_v12  ;;  %s747_s19 = scalar_lea.vmem %s746_s17, 256  ;;  %p748_p10 = scmp.lt.s32.totalorder %s1096_s24, %s746_s17 }
  0x71   : > { %v1085_v10 = vsel %vm363_vm1, 0.0, %v362_v9  ;;  %v333_v17 = vmul.f32 1.442695, %v332_v13  ;;  %v343_v18 = vmul.f32 1.442695, %v342_v14  ;;  %p744_p7 = pneg %p743_p0  ;;  %p749_p13 = scmp.lt.s32.totalorder %s747_s19, %s741_s7 }
  0x72   : > { %373 = vst [vmem:[%s276_s20] sm:$0xff] %v1085_v10  ;;  %659 = vpow2.f32 %v313_v15 }
  0x73   : > { %p750_p1 = por %p749_p13, %p748_p10 }
  0x75   : > { %p751_p12 = pnand %p750_p1, %p744_p7 }
  0x77   : > { %754 = shalt.err (!%p751_p12)
}
  0x78   : > { %s755_s20 = scalar_lea.hbm %s1094_s21, 128  ;;  %s759_s15 = scalar_lea.hbm %s1193_s4, 256 }
  0x79   : > { %p756_p4 = scmp.ne.s32.totalorder %s1094_s21, %s755_s20  ;;  %p760_p8 = scmp.lt.u32.totalorder %s1094_s21, %s1193_s4 }
  0x7a   : > { %p761_p2 = scmp.lt.u32.totalorder %s759_s15, %s755_s20  ;;  %p763_p11 = scmp.lt.u32.totalorder %s755_s20, %s1094_s21 }
  0x7b   : > { %p757_p9 = pnand %p756_p4, %p1206_p3 }
  0x7c   : > { %p762_p6 = por %p761_p2, %p760_p8 }
  0x7d   : > { %p758_p5 = pneg %p757_p9 }
  0x7e   : > { %p764_p0 = por %p763_p11, %p762_p6 }
  0x80   : > { %p765_p7 = pnand %p764_p0, %p758_p5 }
  0x82   : > { %768 = shalt.err (!%p765_p7)
}
  0x83   : > { %588 = dma.vmem_to_hbm [thread:$0]  (%p1206_p3), %s1096_s24, 128, %s1094_s21, %s380_s18   ;;  %661 = vpow2.f32 %v323_v16  ;;  %vm316_vm2 = vcmp.eq.s32.totalorder %v1073_v5, 0  ;;  %vm326_vm3 = vcmp.eq.s32.totalorder %v1073_v5, 1  ;;  %v660_v21 = vpop.eup %659  ;;  %vm336_vm4 = vcmp.eq.s32.totalorder %v1073_v5, 2 }
  0x84   : > { %663 = vpow2.f32 %v333_v17  ;;  %s286_s10 = scvt.s32.f32 %s1081_s5  ;;  %s288_s7 = scvt.s32.f32 %s1083_s14  ;;  %v317_v24 = vsel %vm316_vm2, %v660_v21, 0.0  ;;  %vm346_vm5 = vcmp.eq.s32.totalorder %v1073_v5, 3  ;;  %v869_v42 = vmov 0.0  }
  0x85   : > { %665 = vpow2.f32 %v343_v18  ;;  %s290_s19 = scvt.s32.f32 %s1087_s30  ;;  %s292_s8 = scvt.s32.f32 %s1098_s23  ;;  %v572_v43 = vsel %vm296_vm0, 1.0, %v869_v42 }
  0x86   : > { %v319_v19 = vstv %s286_s10  ;;  %v329_v20 = vstv %s288_s7  ;;  %s269_s24 = scalar_lea.vmem [#allocation9], %s1065_s22  ;;  %s1207_s14 = sshll.u32 %s853_s28, 7 }
  0x87   : > { %v339_v22 = vstv %s290_s19  ;;  %v320_v25 = vmul.f32 %v660_v21, %v319_v19  ;;  %v349_v26 = vstv %s292_s8  ;;  %s394_s5 = sshll.u32 %s269_s24, 4  ;;  %s1140_s23 = scalar_lea.hbm %s1192_s3, %s1207_s14  ;;  %s1142_s5 = int_to_ptr.vmem [resolvable:$true] %s394_s5 }
  0x88   : > { %s375_s18 = scalar_lea.sflag [#allocation6], %s1056_s16  ;;  %s769_s20 = scalar_lea.vmem %s1142_s5, 128 }
  0x89   : > { %p770_p10 = scmp.ne.s32.totalorder %s1142_s5, %s769_s20  ;;  %s870_s22 = smov [#allocation9]  }
  0x8a   : > { %s773_s9 = sshll.u32 %s870_s22, 4  ;;  %s774_s9 = int_to_ptr.vmem [resolvable:$false] %s773_s9 }
  0x8b   : > { %p771_p13 = pnand %p770_p10, %p1206_p3  ;;  %s775_s28 = scalar_lea.vmem %s774_s9, 256 }
  0x8c   : > { %p776_p12 = scmp.lt.s32.totalorder %s1142_s5, %s774_s9  ;;  %p777_p4 = scmp.lt.s32.totalorder %s775_s28, %s769_s20 }
  0x8d   : > { %v662_v23 = vpop.eup %661  ;;  %p772_p1 = pneg %p771_p13 }
  0x8e   : > { %v664_v27 = vpop.eup %663  ;;  %v325_v28 = vadd.f32 %v662_v23, %v660_v21  ;;  %v327_v29 = vsel %vm326_vm3, %v662_v23, 0.0  ;;  %v330_v30 = vmul.f32 %v662_v23, %v329_v20  ;;  %p778_p9 = por %p777_p4, %p776_p12 }
  0x8f   : > { %v666_v31 = vpop.eup %665  ;;  %v328_v32 = vadd.f32 %v327_v29, %v317_v24  ;;  %v337_v33 = vsel %vm336_vm4, %v664_v27, 0.0  ;;  %v340_v34 = vmul.f32 %v664_v27, %v339_v22 }
  0x90   : > { %v331_v35 = vadd.f32 %v330_v30, %v320_v25  ;;  %v335_v36 = vadd.f32 %v664_v27, %v325_v28  ;;  %v350_v37 = vmul.f32 %v666_v31, %v349_v26  ;;  %v347_v39 = vsel %vm346_vm5, %v666_v31, 0.0  ;;  %p779_p5 = pnand %p778_p9, %p772_p1 }
  0x91   : > { %v338_v38 = vadd.f32 %v337_v33, %v328_v32 }
  0x92   : > { %v341_v40 = vadd.f32 %v340_v34, %v331_v35  ;;  %v345_v41 = vadd.f32 %v666_v31, %v335_v36 }
  0x93   : > { %v348_v44 = vadd.f32 %v347_v39, %v338_v38 }
  0x94   : > { %v351_v45 = vadd.f32 %v350_v37, %v341_v40  ;;  %v356_v47 = vmul.f32 1e-07, %v345_v41  ;;  %667 = vlog2.f32 %v345_v41 }
  0x96   : > { %v352_v46 = vmul.f32 %v572_v43, %v351_v45 }
  0x98   : > { %v353_v48 = vadd.f32 %v352_v46, %v348_v44 }
  0x9a   : > { %v357_v49 = vadd.f32 %v356_v47, %v353_v48 }
  0x9c   : > { %669 = vlog2.f32 %v357_v49 }
  0x9e   : > { %v668_v50 = vpop.eup %667 }
  0x9f   : > { %v355_v51 = vmul.f32 0.6931472, %v668_v50 }
  0xa6   : > { %v670_v52 = vpop.eup %669 }
  0xa7   : > { %v359_v53 = vmul.f32 0.6931472, %v670_v52 }
  0xa9   : > { %v360_v54 = vsub.f32 %v355_v51, %v359_v53 }
  0xab   : > { %v365_v55 = vmul.f32 %v1085_v10, %v360_v54 }
  0xad   : > { %370 = vst [vmem:[%s269_s24] sm:$0xff] %v365_v55 }
  0xae   : > { %782 = shalt.err (!%p779_p5)
}
  0xaf   : > { %s783_s16 = scalar_lea.hbm %s1140_s23, 128  ;;  %s787_s10 = scalar_lea.hbm %s1192_s3, 256 }
  0xb0   : > { %p784_p8 = scmp.ne.s32.totalorder %s1140_s23, %s783_s16  ;;  %p788_p11 = scmp.lt.u32.totalorder %s1140_s23, %s1192_s3 }
  0xb1   : > { %p789_p0 = scmp.lt.u32.totalorder %s787_s10, %s783_s16  ;;  %p791_p10 = scmp.lt.u32.totalorder %s783_s16, %s1140_s23 }
  0xb2   : > { %p785_p2 = pnand %p784_p8, %p1206_p3 }
  0xb3   : > { %p790_p7 = por %p789_p0, %p788_p11 }
  0xb4   : > { %p786_p6 = pneg %p785_p2 }
  0xb5   : > { %p792_p13 = por %p791_p10, %p790_p7 }
  0xb7   : > { %p793_p1 = pnand %p792_p13, %p786_p6 }
  0xb9   : > { %796 = shalt.err (!%p793_p1)
}
  0xba   : > { %587 = dma.vmem_to_hbm [thread:$0]  (%p1206_p3), %s1142_s5, 128, %s1140_s23, %s375_s18  }
  0xbb PF: > { %s420_s8 = sand.u32 1, %s841_s25   ;;  %p1208_p12 = scmp.ne.s32.totalorder %s1200_s13, 0 }
  0xbc   : > { %p1209_p4 = scmp.ge.s32.totalorder %s861_s29, 2  ;;  %s421_s24 = scalar_lea.sflag [#allocation6], %s420_s8 }
  0xbe   : > { %p599_p9 = pnand %p1209_p4, %p1208_p12 }
  0xc0   : > { %832 = dma.done.wait (!%p599_p9), %s421_s24, 128  }
  0xc1   : > { %834 = vsyncadd (!%p599_p9), %s421_s24, 4294967168  ;;  %s430_s14 = scalar_lea.sflag [#allocation11], %s420_s8 }
  0xc2   : > { %836 = dma.done.wait (!%p599_p9), %s430_s14, 128  }
  0xc3   : > { %838 = vsyncadd (!%p599_p9), %s430_s14, 4294967168  ;;  %s31_s29 = sadd.s32 1, %s861_s29   ;;  %s1210_s25 = smov %s845_s26 }
  0xc4   : > { %p28_p5 = scmp.ge.s32.totalorder %s31_s29, 4   ;;  %s1211_s26 = smov %s849_s27 }
  0xc5   : > { %s1212_s27 = smov %s964_s12  ;;  %s1213_s28 = smov %s857_s0 }
  0xc6   : > { %s1214_s0 = smov %s1216_s6  ;;  %30 = sbr.rel (!%p28_p5) target bundleno = 22 (0x16), region = 110 }
  0xcd   :  { %435 = vsyncpa [#allocation5], 1 }
  0xce   :  { %437 = vsyncpa [#allocation5 + $0x1], 1 }
  0xcf   :  { %438 = vsyncpa [#allocation8], 1 }
  0xd0   :  { %440 = vsyncpa [#allocation8 + $0x1], 1 }
  0xd1   :  { %441 = vsyncpa [#allocation6], 1 }
  0xd2   :  { %443 = vsyncpa [#allocation6 + $0x1], 1 }
  0xd3   :  { %444 = vsyncpa [#allocation11], 1 }
  0xd4   :  { %446 = vsyncpa [#allocation11 + $0x1], 1 }

</bundles_post_ra>
